<compile_context>
chip_gen: v6e
topology: v6e:2x2x1
jax: 0.10.0
libtpu: 0.0.40
codegen_flags: <defaults>
</compile_context>

<pallas_src>
import jax
import jax.numpy as jnp
from jax.experimental import pallas as pl
from jax.experimental.pallas import tpu as pltpu


# ----------------------------------------------------------------------------
# GRU math (PyTorch gate order r, z, n; matches torch.nn.GRU exactly):
#   r  = sigmoid(x @ Wxr + bxr + h @ Whr + bhr)
#   z  = sigmoid(x @ Wxz + bxz + h @ Whz + bhz)
#   n  = tanh   (x @ Wxn + bxn + r * (h @ Whn + bhn))
#   h' = (1 - z) * n + z * h
# Weights are stored merged along the gate axis: W_i (in_dim, 3H), W_h (H, 3H).
# The input-side bias b_gi folds b_ih + b_hh for the r/z gates (exact, since
# those biases are simply added); the n-gate hidden bias b_hn stays separate
# because it is multiplied by r.  (All biases are 0 per the reference init.)
# ----------------------------------------------------------------------------


# ----------------------------------------------------------------------------
# Encoder: whole-sequence GRU in a single kernel invocation.
# ----------------------------------------------------------------------------
def _gru_encoder_kernel(x_ref, h0_ref, wih_ref, whh_ref, bgi_ref, bhn_ref,
                        out_ref, hT_ref):
    T, B, H = out_ref.shape

    # Hoisted input projection: ONE (T*B, E) @ (E, 3H) MXU matmul outside the
    # serial h->h dependency chain, with the folded input bias added once.
    gi_all = (jnp.dot(x_ref[...].astype(jnp.float32), wih_ref[...],
                      preferred_element_type=jnp.float32)
              + bgi_ref[...])                                   # (T*B, 3H)

    whh = whh_ref[...]                                          # (H, 3H), vreg-resident
    bhn = jnp.broadcast_to(bhn_ref[...], (B, H))                # broadcast ONCE (no per-step bcast)
    h = h0_ref[0].astype(jnp.float32)                           # (B, H)

    # TODO(synk): for production-length T this recurrence would use
    # lax.fori_loop with partial unroll over a T-chunked grid (hidden carried in
    # VMEM scratch) to bound code size / vreg pressure; at T=8 a static unroll
    # is cheapest and keeps only one matmul per step on the serial chain.
    for t in range(T):
        g = gi_all[t * B:(t + 1) * B]                           # static slice (B, 3H)
        gh = jnp.dot(h, whh, preferred_element_type=jnp.float32)  # (B, 3H) — only serial-chain matmul
        r = jax.nn.sigmoid(g[:, :H] + gh[:, :H])
        z = jax.nn.sigmoid(g[:, H:2 * H] + gh[:, H:2 * H])
        n = jnp.tanh(g[:, 2 * H:] + r * (gh[:, 2 * H:] + bhn))
        h = (1.0 - z) * n + z * h
        out_ref[t] = h.astype(out_ref.dtype)
    hT_ref[0] = h.astype(hT_ref.dtype)                          # final hidden, stored exactly once


def gru_encode(x2d, h0, wih, whh, b_gi, b_hn, T, B):
    """x2d: (T*B, E) embedded tokens, h0: (1, B, H).
    wih: (E, 3H), whh: (H, 3H), b_gi: (1, 3H), b_hn: (1, H)."""
    H = h0.shape[-1]
    return pl.pallas_call(
        _gru_encoder_kernel,
        out_shape=(jax.ShapeDtypeStruct((T, B, H), x2d.dtype),
                   jax.ShapeDtypeStruct((1, B, H), x2d.dtype)),
        compiler_params=pltpu.CompilerParams(vmem_limit_bytes=32 * 1024 * 1024),
    )(x2d, h0, wih, whh, b_gi, b_hn)


# ----------------------------------------------------------------------------
# Decoder: fused attention + GRU cell, grid over decode steps.  Weights,
# enc_outputs and the initial hidden state stay VMEM-resident (constant
# index_maps); the running hidden state is carried in VMEM scratch.
# ----------------------------------------------------------------------------
def _attn_gru_decoder_kernel(emb_ref, h0_ref, enc_ref,
                             wx_ref, wc_ref, whh_ref, bgi_ref, bhn_ref,
                             out_ref, *rest):
    if len(rest) == 2:
        attn_ref, h_scr = rest
    else:
        attn_ref = None
        (h_scr,) = rest
    H = h_scr.shape[-1]

    @pl.when(pl.program_id(0) == 0)
    def _():
        h_scr[...] = h0_ref[0].astype(jnp.float32)

    h = h_scr[...]                                # (B, H) — previous hidden state
    enc = enc_ref[...].astype(jnp.float32)        # (B, T, H), lane-dense (T on lanes)
    emb = emb_ref[0].astype(jnp.float32)          # (B, E)

    # ---- dot-product attention over encoder time steps (MXU contractions) ----
    s = jnp.einsum('bqh,bth->bqt', h[:, None, :], enc,
                   preferred_element_type=jnp.float32)            # (B, 1, T)
    m = jnp.max(s, axis=-1, keepdims=True)
    e = jnp.exp(s - m)
    w = e * pl.reciprocal(jnp.sum(e, axis=-1, keepdims=True), approx=False)
    ctx = jnp.einsum('bqt,bth->bqh', w, enc,
                     preferred_element_type=jnp.float32)[:, 0, :]  # (B, H)

    # ---- GRU cell on concat(embedded, context): emb@Wx + ctx@Wc (no concat) ----
    gi = (jnp.dot(emb, wx_ref[...], preferred_element_type=jnp.float32)
          + jnp.dot(ctx, wc_ref[...], preferred_element_type=jnp.float32)
          + bgi_ref[...])                                          # (B, 3H)
    gh = jnp.dot(h, whh_ref[...], preferred_element_type=jnp.float32)
    r = jax.nn.sigmoid(gi[:, :H] + gh[:, :H])
    z = jax.nn.sigmoid(gi[:, H:2 * H] + gh[:, H:2 * H])
    n = jnp.tanh(gi[:, 2 * H:] + r * (gh[:, 2 * H:] + bhn_ref[...]))
    h_new = (1.0 - z) * n + z * h

    h_scr[...] = h_new                             # carried to the next decode step
    out_ref[0] = h_new.astype(out_ref.dtype)       # single output (== new hidden)
    if attn_ref is not None:                       # only when return_attn=True
        attn_ref[0] = w[:, 0, :].astype(attn_ref.dtype)   # already (B, T): no transpose


def gru_attn_decode(emb_seq, hidden, enc_bth, wx, wc, whh, b_gi, b_hn, *,
                    return_attn):
    """Fused attention + GRU decode over Td steps in ONE pallas_call.
    emb_seq: (Td, B, E), hidden: (1, B, H), enc_bth: (B, T, H)."""
    Td, B, E = emb_seq.shape
    _, T, H = enc_bth.shape

    out_shape = [jax.ShapeDtypeStruct((Td, B, H), hidden.dtype)]
    out_specs = [pl.BlockSpec((1, B, H), lambda i: (i, 0, 0))]
    if return_attn:
        out_shape.append(jax.ShapeDtypeStruct((Td, B, T), jnp.float32))
        out_specs.append(pl.BlockSpec((1, B, T), lambda i: (i, 0, 0)))

    grid_spec = pltpu.PrefetchScalarGridSpec(
        num_scalar_prefetch=0,
        grid=(Td,),
        in_specs=[
            pl.BlockSpec((1, B, E), lambda i: (i, 0, 0)),      # embedded token, per step
            pl.BlockSpec((1, B, H), lambda i: (0, 0, 0)),      # initial hidden, resident
            pl.BlockSpec((B, T, H), lambda i: (0, 0, 0)),      # enc outputs, resident
            pl.BlockSpec((E, 3 * H), lambda i: (0, 0)),        # Wx, resident
            pl.BlockSpec((H, 3 * H), lambda i: (0, 0)),        # Wc, resident
            pl.BlockSpec((H, 3 * H), lambda i: (0, 0)),        # Whh, resident
            pl.BlockSpec((1, 3 * H), lambda i: (0, 0)),        # folded input bias
            pl.BlockSpec((1, H), lambda i: (0, 0)),            # n-gate hidden bias
        ],
        out_specs=tuple(out_specs),
        scratch_shapes=[pltpu.VMEM((B, H), jnp.float32)],      # hidden carry across steps
    )
    return pl.pallas_call(
        _attn_gru_decoder_kernel,
        grid_spec=grid_spec,
        out_shape=tuple(out_shape),
        compiler_params=pltpu.CompilerParams(
            dimension_semantics=("arbitrary",),                # sequential (carried hidden)
            vmem_limit_bytes=32 * 1024 * 1024),
    )(emb_seq, hidden, enc_bth, wx, wc, whh, b_gi, b_hn)


# ----------------------------------------------------------------------------
# Seq2seq model (parameters + forward glue)
# ----------------------------------------------------------------------------
class Seq2seqPallas:
    def __init__(self, in_embedding, out_embedding, hidden_dim, key, dropout=0.0):
        in_vocab, in_dim = in_embedding
        out_vocab, out_dim = out_embedding
        H = hidden_dim
        self.hidden_dim = H
        self.dropout_p = dropout   # eval-mode identity (see forward)
        keys = jax.random.split(key, 6)

        # nn.Embedding default init: N(0, 1)
        self.in_emb = jax.random.normal(keys[0], (in_vocab, in_dim), jnp.float32)
        self.out_emb = jax.random.normal(keys[1], (out_vocab, out_dim), jnp.float32)

        def xavier_merged(k, fan_in, h):
            # xavier_uniform_ on the PyTorch (3H, fan_in) weight_ih matrix, stored
            # transposed as a single merged (fan_in, 3H) matrix, gate order (r,z,n).
            bound = (6.0 / (fan_in + 3 * h)) ** 0.5
            return jax.random.uniform(k, (fan_in, 3 * h), jnp.float32, -bound, bound)

        def ortho_merged(k, h):
            # orthogonal_ on the (3H, H) weight_hh matrix, stored transposed (H, 3H).
            w = jax.nn.initializers.orthogonal()(k, (3 * h, h), jnp.float32)
            return jnp.transpose(w)

        # encoder GRU: input size = in_dim
        self.enc_wih = xavier_merged(keys[2], in_dim, H)       # (E, 3H)
        self.enc_whh = ortho_merged(keys[3], H)                # (H, 3H)
        # folded biases (b_ih + b_hh for r/z, b_ih for n) and separate n-gate
        # hidden bias; all zeros per the reference `param.data.fill_(0)`.
        self.enc_b_gi = jnp.zeros((1, 3 * H), jnp.float32)
        self.enc_b_hn = jnp.zeros((1, H), jnp.float32)

        # decoder GRU: input size = out_dim + H (concat of embedded token + context).
        # Split the xavier-initialised (out_dim+H, 3H) matrix into an embedding part
        # and a context part so the kernel never materialises the concat.
        dec_w = xavier_merged(keys[4], out_dim + H, H)         # (out_dim+H, 3H)
        self.dec_wx = dec_w[:out_dim, :]                       # (out_dim, 3H)
        self.dec_wc = dec_w[out_dim:, :]                       # (H, 3H)
        self.dec_whh = ortho_merged(keys[5], H)                # (H, 3H)
        self.dec_b_gi = jnp.zeros((1, 3 * H), jnp.float32)
        self.dec_b_hn = jnp.zeros((1, H), jnp.float32)

    # -- single-step forward, matching the PyTorch module's API ------------------
    def forward(self, input, hidden, batch_size, encoding, enc_outputs,
                return_attn=False):
        if encoding:
            T = input.shape[0]
            # TODO(synk): the embedding row-gather could be fused into the kernel via
            # PrefetchScalarGridSpec + a pl.Element gather at production vocab sizes;
            # kept in XLA at this size.
            emb = jnp.take(self.in_emb, input.reshape(-1), axis=0)   # (T*B, E)
            output, hidden = gru_encode(emb, hidden,
                                        self.enc_wih, self.enc_whh,
                                        self.enc_b_gi, self.enc_b_hn,
                                        T, batch_size)
            return output, hidden
        else:
            # TODO(synk): dropout on the embedded decoder input is identity (eval
            # mode); training-mode masking would use pltpu.prng_random_bits in-kernel.
            emb = jnp.take(self.out_emb, input.reshape(-1),
                           axis=0).reshape(1, batch_size, -1)        # (1, B, E)
            # lane-dense layout for the attention kernel (T on lanes, no in-kernel
            # transpose); pure layout plumbing in the wrapper.
            enc_bth = jnp.transpose(enc_outputs, (1, 0, 2))          # (B, T, H)
            res = gru_attn_decode(emb, hidden, enc_bth,
                                  self.dec_wx, self.dec_wc, self.dec_whh,
                                  self.dec_b_gi, self.dec_b_hn,
                                  return_attn=return_attn)
            if return_attn:
                out_seq, attn_seq = res
                # output == new hidden for a single-layer single-step GRU
                return out_seq, out_seq, attn_seq[0]
            (out_seq,) = res
            return out_seq, out_seq

    # -- fused multi-step (teacher-forced) decode: ONE pallas_call for all steps --
    def decode_sequence(self, tokens, hidden, batch_size, enc_outputs,
                        return_attn=False):
        Td = tokens.shape[0]
        emb_seq = jnp.take(self.out_emb, tokens.reshape(-1),
                           axis=0).reshape(Td, batch_size, -1)       # (Td, B, E)
        enc_bth = jnp.transpose(enc_outputs, (1, 0, 2))              # (B, T, H)
        res = gru_attn_decode(emb_seq, hidden, enc_bth,
                              self.dec_wx, self.dec_wc, self.dec_whh,
                              self.dec_b_gi, self.dec_b_hn,
                              return_attn=return_attn)
        if return_attn:
            out_seq, attn_seq = res
            return out_seq, out_seq[-1:], attn_seq
        (out_seq,) = res
        return out_seq, out_seq[-1:]


if __name__ == "__main__":
    key = jax.random.PRNGKey(0)
    k_model, k_src, k_tgt = jax.random.split(key, 3)

    B, T, E, H = 2, 8, 32, 32
    VOCAB_IN, VOCAB_OUT = 20, 20

    model = Seq2seqPallas((VOCAB_IN, E), (VOCAB_OUT, E), H, k_model, dropout=0.1)

    # Encoder pass (whole sequence, single fused kernel)
    src_tokens = jax.random.randint(k_src, (T, B), 0, VOCAB_IN)
    h0 = jnp.zeros((1, B, H), jnp.float32)
    enc_outputs, enc_hidden = model.forward(src_tokens, h0, B,
                                            encoding=True, enc_outputs=None)

    # Decoder: per-step path (forward API) vs fully fused decode (one kernel)
    Td = 5
    tgt_tokens = jax.random.randint(k_tgt, (Td, B), 0, VOCAB_OUT)

    hidden = enc_hidden
    step_outs = []
    attn0 = None
    for i in range(Td):
        out, hidden, attn = model.forward(tgt_tokens[i:i + 1], hidden, B,
                                          encoding=False,
                                          enc_outputs=enc_outputs,
                                          return_attn=True)
        if i == 0:
            attn0 = attn
        step_outs.append(out)
    step_outs = jnp.concatenate(step_outs, axis=0)

    fused_outs, fused_hidden, fused_attn = model.decode_sequence(
        tgt_tokens, enc_hidden, B, enc_outputs, return_attn=True)

    jax.block_until_ready((enc_outputs, enc_hidden, step_outs, hidden,
                           fused_outs, fused_hidden, fused_attn))

    assert enc_outputs.shape == (T, B, H)
    assert enc_hidden.shape == (1, B, H)
    assert step_outs.shape == (Td, B, H)
    assert hidden.shape == (1, B, H)
    assert attn0.shape == (B, T)
    assert fused_outs.shape == (Td, B, H)
    assert fused_hidden.shape == (1, B, H)
    assert fused_attn.shape == (Td, B, T)
    # attention rows are an exact softmax over T (exact reciprocal now)
    assert bool(jnp.all(jnp.abs(jnp.sum(fused_attn, axis=-1) - 1.0) < 1e-4))
    assert bool(jnp.all(jnp.abs(jnp.sum(attn0, axis=-1) - 1.0) < 1e-4))
    # fused multi-step decode == repeated single-step decode
    assert bool(jnp.allclose(fused_outs, step_outs, atol=1e-5, rtol=1e-5))
    assert bool(jnp.allclose(fused_hidden, hidden, atol=1e-5, rtol=1e-5))
    print("KERNEL_OK")
</pallas_src>

<mosaic_0001>
module attributes {stable_mosaic.version = 11 : i64} {
  func.func @_gru_encoder_kernel(%arg0: memref<16x32xf32, #tpu.memory_space<vmem>>, %arg1: memref<1x2x32xf32, #tpu.memory_space<vmem>>, %arg2: memref<32x96xf32, #tpu.memory_space<vmem>>, %arg3: memref<32x96xf32, #tpu.memory_space<vmem>>, %arg4: memref<1x96xf32, #tpu.memory_space<vmem>>, %arg5: memref<1x32xf32, #tpu.memory_space<vmem>>, %arg6: memref<8x2x32xf32, #tpu.memory_space<vmem>>, %arg7: memref<1x2x32xf32, #tpu.memory_space<vmem>>) attributes {dimension_semantics = [], scalar_prefetch = 0 : i64, scratch_operands = 0 : i64, tpu.core_type = #tpu.core_type<tc>} {
    %c0 = arith.constant 0 : index
    %c0_0 = arith.constant 0 : index
    %0 = vector.load %arg0[%c0, %c0_0] : memref<16x32xf32, #tpu.memory_space<vmem>>, vector<16x32xf32>
    %c0_1 = arith.constant 0 : index
    %c0_2 = arith.constant 0 : index
    %1 = vector.load %arg2[%c0_1, %c0_2] : memref<32x96xf32, #tpu.memory_space<vmem>>, vector<32x96xf32>
    %cst = arith.constant dense<0.000000e+00> : vector<16x96xf32>
    %2 = tpu.matmul %0, %1, %cst {dimension_numbers = #tpu.dot_dimension_numbers<[1], [0], [0], [1], [0, 0, 1, 1], [], []>} : vector<16x32xf32>, vector<32x96xf32>, vector<16x96xf32> -> vector<16x96xf32>
    %c0_3 = arith.constant 0 : index
    %c0_4 = arith.constant 0 : index
    %3 = vector.load %arg4[%c0_3, %c0_4] : memref<1x96xf32, #tpu.memory_space<vmem>>, vector<1x96xf32>
    %4 = vector.broadcast %3 : vector<1x96xf32> to vector<16x96xf32>
    %5 = arith.addf %2, %4 : vector<16x96xf32>
    %c0_5 = arith.constant 0 : index
    %c0_6 = arith.constant 0 : index
    %6 = vector.load %arg3[%c0_5, %c0_6] : memref<32x96xf32, #tpu.memory_space<vmem>>, vector<32x96xf32>
    %c0_7 = arith.constant 0 : index
    %c0_8 = arith.constant 0 : index
    %7 = vector.load %arg5[%c0_7, %c0_8] : memref<1x32xf32, #tpu.memory_space<vmem>>, vector<1x32xf32>
    %8 = vector.shape_cast %7 : vector<1x32xf32> to vector<1x32xf32>
    %9 = vector.broadcast %8 : vector<1x32xf32> to vector<2x32xf32>
    %c0_9 = arith.constant 0 : index
    %c0_10 = arith.constant 0 : index
    %c0_11 = arith.constant 0 : index
    %10 = vector.load %arg1[%c0_9, %c0_10, %c0_11] : memref<1x2x32xf32, #tpu.memory_space<vmem>>, vector<1x2x32xf32>
    %11 = vector.shape_cast %10 : vector<1x2x32xf32> to vector<2x32xf32>
    %12 = vector.extract_strided_slice %5 {offsets = [0, 0], sizes = [2, 96], strides = [1, 1]} : vector<16x96xf32> to vector<2x96xf32>
    %cst_12 = arith.constant dense<0.000000e+00> : vector<2x96xf32>
    %13 = tpu.matmul %11, %6, %cst_12 {dimension_numbers = #tpu.dot_dimension_numbers<[1], [0], [0], [1], [0, 0, 1, 1], [], []>} : vector<2x32xf32>, vector<32x96xf32>, vector<2x96xf32> -> vector<2x96xf32>
    %14 = vector.extract_strided_slice %12 {offsets = [0, 0], sizes = [2, 32], strides = [1, 1]} : vector<2x96xf32> to vector<2x32xf32>
    %15 = vector.extract_strided_slice %13 {offsets = [0, 0], sizes = [2, 32], strides = [1, 1]} : vector<2x96xf32> to vector<2x32xf32>
    %16 = arith.addf %14, %15 : vector<2x32xf32>
    %17 = arith.negf %16 : vector<2x32xf32>
    %18 = math.exp %17 : vector<2x32xf32>
    %cst_13 = arith.constant 1.000000e+00 : f32
    %19 = vector.broadcast %cst_13 : f32 to vector<2x32xf32>
    %20 = arith.addf %19, %18 : vector<2x32xf32>
    %21 = arith.divf %19, %20 : vector<2x32xf32>
    %22 = vector.extract_strided_slice %12 {offsets = [0, 32], sizes = [2, 32], strides = [1, 1]} : vector<2x96xf32> to vector<2x32xf32>
    %23 = vector.extract_strided_slice %13 {offsets = [0, 32], sizes = [2, 32], strides = [1, 1]} : vector<2x96xf32> to vector<2x32xf32>
    %24 = arith.addf %22, %23 : vector<2x32xf32>
    %25 = arith.negf %24 : vector<2x32xf32>
    %26 = math.exp %25 : vector<2x32xf32>
    %cst_14 = arith.constant 1.000000e+00 : f32
    %27 = vector.broadcast %cst_14 : f32 to vector<2x32xf32>
    %28 = arith.addf %27, %26 : vector<2x32xf32>
    %29 = arith.divf %27, %28 : vector<2x32xf32>
    %30 = vector.extract_strided_slice %12 {offsets = [0, 64], sizes = [2, 32], strides = [1, 1]} : vector<2x96xf32> to vector<2x32xf32>
    %31 = vector.extract_strided_slice %13 {offsets = [0, 64], sizes = [2, 32], strides = [1, 1]} : vector<2x96xf32> to vector<2x32xf32>
    %32 = arith.addf %31, %9 : vector<2x32xf32>
    %33 = arith.mulf %21, %32 : vector<2x32xf32>
    %34 = arith.addf %30, %33 : vector<2x32xf32>
    %35 = math.tanh %34 : vector<2x32xf32>
    %cst_15 = arith.constant 1.000000e+00 : f32
    %36 = vector.broadcast %cst_15 : f32 to vector<2x32xf32>
    %37 = arith.subf %36, %29 : vector<2x32xf32>
    %38 = arith.mulf %37, %35 : vector<2x32xf32>
    %39 = arith.mulf %29, %11 : vector<2x32xf32>
    %40 = arith.addf %38, %39 : vector<2x32xf32>
    %c0_16 = arith.constant 0 : index
    %c0_17 = arith.constant 0 : index
    %c0_18 = arith.constant 0 : index
    %41 = vector.load %arg6[%c0_16, %c0_17, %c0_18] : memref<8x2x32xf32, #tpu.memory_space<vmem>>, vector<1x2x32xf32>
    %42 = vector.shape_cast %41 : vector<1x2x32xf32> to vector<2x32xf32>
    %43 = vector.shape_cast %40 : vector<2x32xf32> to vector<1x2x32xf32>
    tpu.vector_store %arg6[%c0_16, %c0_17, %c0_18], %43 {strides = array<i32>} : memref<8x2x32xf32, #tpu.memory_space<vmem>>, vector<1x2x32xf32>,
    %44 = vector.extract_strided_slice %5 {offsets = [2, 0], sizes = [2, 96], strides = [1, 1]} : vector<16x96xf32> to vector<2x96xf32>
    %cst_19 = arith.constant dense<0.000000e+00> : vector<2x96xf32>
    %45 = tpu.matmul %40, %6, %cst_19 {dimension_numbers = #tpu.dot_dimension_numbers<[1], [0], [0], [1], [0, 0, 1, 1], [], []>} : vector<2x32xf32>, vector<32x96xf32>, vector<2x96xf32> -> vector<2x96xf32>
    %46 = vector.extract_strided_slice %44 {offsets = [0, 0], sizes = [2, 32], strides = [1, 1]} : vector<2x96xf32> to vector<2x32xf32>
    %47 = vector.extract_strided_slice %45 {offsets = [0, 0], sizes = [2, 32], strides = [1, 1]} : vector<2x96xf32> to vector<2x32xf32>
    %48 = arith.addf %46, %47 : vector<2x32xf32>
    %49 = arith.negf %48 : vector<2x32xf32>
    %50 = math.exp %49 : vector<2x32xf32>
    %cst_20 = arith.constant 1.000000e+00 : f32
    %51 = vector.broadcast %cst_20 : f32 to vector<2x32xf32>
    %52 = arith.addf %51, %50 : vector<2x32xf32>
    %53 = arith.divf %51, %52 : vector<2x32xf32>
    %54 = vector.extract_strided_slice %44 {offsets = [0, 32], sizes = [2, 32], strides = [1, 1]} : vector<2x96xf32> to vector<2x32xf32>
    %55 = vector.extract_strided_slice %45 {offsets = [0, 32], sizes = [2, 32], strides = [1, 1]} : vector<2x96xf32> to vector<2x32xf32>
    %56 = arith.addf %54, %55 : vector<2x32xf32>
    %57 = arith.negf %56 : vector<2x32xf32>
    %58 = math.exp %57 : vector<2x32xf32>
    %cst_21 = arith.constant 1.000000e+00 : f32
    %59 = vector.broadcast %cst_21 : f32 to vector<2x32xf32>
    %60 = arith.addf %59, %58 : vector<2x32xf32>
    %61 = arith.divf %59, %60 : vector<2x32xf32>
    %62 = vector.extract_strided_slice %44 {offsets = [0, 64], sizes = [2, 32], strides = [1, 1]} : vector<2x96xf32> to vector<2x32xf32>
    %63 = vector.extract_strided_slice %45 {offsets = [0, 64], sizes = [2, 32], strides = [1, 1]} : vector<2x96xf32> to vector<2x32xf32>
    %64 = arith.addf %63, %9 : vector<2x32xf32>
    %65 = arith.mulf %53, %64 : vector<2x32xf32>
    %66 = arith.addf %62, %65 : vector<2x32xf32>
    %67 = math.tanh %66 : vector<2x32xf32>
    %cst_22 = arith.constant 1.000000e+00 : f32
    %68 = vector.broadcast %cst_22 : f32 to vector<2x32xf32>
    %69 = arith.subf %68, %61 : vector<2x32xf32>
    %70 = arith.mulf %69, %67 : vector<2x32xf32>
    %71 = arith.mulf %61, %40 : vector<2x32xf32>
    %72 = arith.addf %70, %71 : vector<2x32xf32>
    %c1 = arith.constant 1 : index
    %c0_23 = arith.constant 0 : index
    %c0_24 = arith.constant 0 : index
    %73 = vector.load %arg6[%c1, %c0_23, %c0_24] : memref<8x2x32xf32, #tpu.memory_space<vmem>>, vector<1x2x32xf32>
    %74 = vector.shape_cast %73 : vector<1x2x32xf32> to vector<2x32xf32>
    %75 = vector.shape_cast %72 : vector<2x32xf32> to vector<1x2x32xf32>
    tpu.vector_store %arg6[%c1, %c0_23, %c0_24], %75 {strides = array<i32>} : memref<8x2x32xf32, #tpu.memory_space<vmem>>, vector<1x2x32xf32>,
    %76 = vector.extract_strided_slice %5 {offsets = [4, 0], sizes = [2, 96], strides = [1, 1]} : vector<16x96xf32> to vector<2x96xf32>
    %cst_25 = arith.constant dense<0.000000e+00> : vector<2x96xf32>
    %77 = tpu.matmul %72, %6, %cst_25 {dimension_numbers = #tpu.dot_dimension_numbers<[1], [0], [0], [1], [0, 0, 1, 1], [], []>} : vector<2x32xf32>, vector<32x96xf32>, vector<2x96xf32> -> vector<2x96xf32>
    %78 = vector.extract_strided_slice %76 {offsets = [0, 0], sizes = [2, 32], strides = [1, 1]} : vector<2x96xf32> to vector<2x32xf32>
    %79 = vector.extract_strided_slice %77 {offsets = [0, 0], sizes = [2, 32], strides = [1, 1]} : vector<2x96xf32> to vector<2x32xf32>
    %80 = arith.addf %78, %79 : vector<2x32xf32>
    %81 = arith.negf %80 : vector<2x32xf32>
    %82 = math.exp %81 : vector<2x32xf32>
    %cst_26 = arith.constant 1.000000e+00 : f32
    %83 = vector.broadcast %cst_26 : f32 to vector<2x32xf32>
    %84 = arith.addf %83, %82 : vector<2x32xf32>
    %85 = arith.divf %83, %84 : vector<2x32xf32>
    %86 = vector.extract_strided_slice %76 {offsets = [0, 32], sizes = [2, 32], strides = [1, 1]} : vector<2x96xf32> to vector<2x32xf32>
    %87 = vector.extract_strided_slice %77 {offsets = [0, 32], sizes = [2, 32], strides = [1, 1]} : vector<2x96xf32> to vector<2x32xf32>
    %88 = arith.addf %86, %87 : vector<2x32xf32>
    %89 = arith.negf %88 : vector<2x32xf32>
    %90 = math.exp %89 : vector<2x32xf32>
    %cst_27 = arith.constant 1.000000e+00 : f32
    %91 = vector.broadcast %cst_27 : f32 to vector<2x32xf32>
    %92 = arith.addf %91, %90 : vector<2x32xf32>
    %93 = arith.divf %91, %92 : vector<2x32xf32>
    %94 = vector.extract_strided_slice %76 {offsets = [0, 64], sizes = [2, 32], strides = [1, 1]} : vector<2x96xf32> to vector<2x32xf32>
    %95 = vector.extract_strided_slice %77 {offsets = [0, 64], sizes = [2, 32], strides = [1, 1]} : vector<2x96xf32> to vector<2x32xf32>
    %96 = arith.addf %95, %9 : vector<2x32xf32>
    %97 = arith.mulf %85, %96 : vector<2x32xf32>
    %98 = arith.addf %94, %97 : vector<2x32xf32>
    %99 = math.tanh %98 : vector<2x32xf32>
    %cst_28 = arith.constant 1.000000e+00 : f32
    %100 = vector.broadcast %cst_28 : f32 to vector<2x32xf32>
    %101 = arith.subf %100, %93 : vector<2x32xf32>
    %102 = arith.mulf %101, %99 : vector<2x32xf32>
    %103 = arith.mulf %93, %72 : vector<2x32xf32>
    %104 = arith.addf %102, %103 : vector<2x32xf32>
    %c2 = arith.constant 2 : index
    %c0_29 = arith.constant 0 : index
    %c0_30 = arith.constant 0 : index
    %105 = vector.load %arg6[%c2, %c0_29, %c0_30] : memref<8x2x32xf32, #tpu.memory_space<vmem>>, vector<1x2x32xf32>
    %106 = vector.shape_cast %105 : vector<1x2x32xf32> to vector<2x32xf32>
    %107 = vector.shape_cast %104 : vector<2x32xf32> to vector<1x2x32xf32>
    tpu.vector_store %arg6[%c2, %c0_29, %c0_30], %107 {strides = array<i32>} : memref<8x2x32xf32, #tpu.memory_space<vmem>>, vector<1x2x32xf32>,
    %108 = vector.extract_strided_slice %5 {offsets = [6, 0], sizes = [2, 96], strides = [1, 1]} : vector<16x96xf32> to vector<2x96xf32>
    %cst_31 = arith.constant dense<0.000000e+00> : vector<2x96xf32>
    %109 = tpu.matmul %104, %6, %cst_31 {dimension_numbers = #tpu.dot_dimension_numbers<[1], [0], [0], [1], [0, 0, 1, 1], [], []>} : vector<2x32xf32>, vector<32x96xf32>, vector<2x96xf32> -> vector<2x96xf32>
    %110 = vector.extract_strided_slice %108 {offsets = [0, 0], sizes = [2, 32], strides = [1, 1]} : vector<2x96xf32> to vector<2x32xf32>
    %111 = vector.extract_strided_slice %109 {offsets = [0, 0], sizes = [2, 32], strides = [1, 1]} : vector<2x96xf32> to vector<2x32xf32>
    %112 = arith.addf %110, %111 : vector<2x32xf32>
    %113 = arith.negf %112 : vector<2x32xf32>
    %114 = math.exp %113 : vector<2x32xf32>
    %cst_32 = arith.constant 1.000000e+00 : f32
    %115 = vector.broadcast %cst_32 : f32 to vector<2x32xf32>
    %116 = arith.addf %115, %114 : vector<2x32xf32>
    %117 = arith.divf %115, %116 : vector<2x32xf32>
    %118 = vector.extract_strided_slice %108 {offsets = [0, 32], sizes = [2, 32], strides = [1, 1]} : vector<2x96xf32> to vector<2x32xf32>
    %119 = vector.extract_strided_slice %109 {offsets = [0, 32], sizes = [2, 32], strides = [1, 1]} : vector<2x96xf32> to vector<2x32xf32>
    %120 = arith.addf %118, %119 : vector<2x32xf32>
    %121 = arith.negf %120 : vector<2x32xf32>
    %122 = math.exp %121 : vector<2x32xf32>
    %cst_33 = arith.constant 1.000000e+00 : f32
    %123 = vector.broadcast %cst_33 : f32 to vector<2x32xf32>
    %124 = arith.addf %123, %122 : vector<2x32xf32>
    %125 = arith.divf %123, %124 : vector<2x32xf32>
    %126 = vector.extract_strided_slice %108 {offsets = [0, 64], sizes = [2, 32], strides = [1, 1]} : vector<2x96xf32> to vector<2x32xf32>
    %127 = vector.extract_strided_slice %109 {offsets = [0, 64], sizes = [2, 32], strides = [1, 1]} : vector<2x96xf32> to vector<2x32xf32>
    %128 = arith.addf %127, %9 : vector<2x32xf32>
    %129 = arith.mulf %117, %128 : vector<2x32xf32>
    %130 = arith.addf %126, %129 : vector<2x32xf32>
    %131 = math.tanh %130 : vector<2x32xf32>
    %cst_34 = arith.constant 1.000000e+00 : f32
    %132 = vector.broadcast %cst_34 : f32 to vector<2x32xf32>
    %133 = arith.subf %132, %125 : vector<2x32xf32>
    %134 = arith.mulf %133, %131 : vector<2x32xf32>
    %135 = arith.mulf %125, %104 : vector<2x32xf32>
    %136 = arith.addf %134, %135 : vector<2x32xf32>
    %c3 = arith.constant 3 : index
    %c0_35 = arith.constant 0 : index
    %c0_36 = arith.constant 0 : index
    %137 = vector.load %arg6[%c3, %c0_35, %c0_36] : memref<8x2x32xf32, #tpu.memory_space<vmem>>, vector<1x2x32xf32>
    %138 = vector.shape_cast %137 : vector<1x2x32xf32> to vector<2x32xf32>
    %139 = vector.shape_cast %136 : vector<2x32xf32> to vector<1x2x32xf32>
    tpu.vector_store %arg6[%c3, %c0_35, %c0_36], %139 {strides = array<i32>} : memref<8x2x32xf32, #tpu.memory_space<vmem>>, vector<1x2x32xf32>,
    %140 = vector.extract_strided_slice %5 {offsets = [8, 0], sizes = [2, 96], strides = [1, 1]} : vector<16x96xf32> to vector<2x96xf32>
    %cst_37 = arith.constant dense<0.000000e+00> : vector<2x96xf32>
    %141 = tpu.matmul %136, %6, %cst_37 {dimension_numbers = #tpu.dot_dimension_numbers<[1], [0], [0], [1], [0, 0, 1, 1], [], []>} : vector<2x32xf32>, vector<32x96xf32>, vector<2x96xf32> -> vector<2x96xf32>
    %142 = vector.extract_strided_slice %140 {offsets = [0, 0], sizes = [2, 32], strides = [1, 1]} : vector<2x96xf32> to vector<2x32xf32>
    %143 = vector.extract_strided_slice %141 {offsets = [0, 0], sizes = [2, 32], strides = [1, 1]} : vector<2x96xf32> to vector<2x32xf32>
    %144 = arith.addf %142, %143 : vector<2x32xf32>
    %145 = arith.negf %144 : vector<2x32xf32>
    %146 = math.exp %145 : vector<2x32xf32>
    %cst_38 = arith.constant 1.000000e+00 : f32
    %147 = vector.broadcast %cst_38 : f32 to vector<2x32xf32>
    %148 = arith.addf %147, %146 : vector<2x32xf32>
    %149 = arith.divf %147, %148 : vector<2x32xf32>
    %150 = vector.extract_strided_slice %140 {offsets = [0, 32], sizes = [2, 32], strides = [1, 1]} : vector<2x96xf32> to vector<2x32xf32>
    %151 = vector.extract_strided_slice %141 {offsets = [0, 32], sizes = [2, 32], strides = [1, 1]} : vector<2x96xf32> to vector<2x32xf32>
    %152 = arith.addf %150, %151 : vector<2x32xf32>
    %153 = arith.negf %152 : vector<2x32xf32>
    %154 = math.exp %153 : vector<2x32xf32>
    %cst_39 = arith.constant 1.000000e+00 : f32
    %155 = vector.broadcast %cst_39 : f32 to vector<2x32xf32>
    %156 = arith.addf %155, %154 : vector<2x32xf32>
    %157 = arith.divf %155, %156 : vector<2x32xf32>
    %158 = vector.extract_strided_slice %140 {offsets = [0, 64], sizes = [2, 32], strides = [1, 1]} : vector<2x96xf32> to vector<2x32xf32>
    %159 = vector.extract_strided_slice %141 {offsets = [0, 64], sizes = [2, 32], strides = [1, 1]} : vector<2x96xf32> to vector<2x32xf32>
    %160 = arith.addf %159, %9 : vector<2x32xf32>
    %161 = arith.mulf %149, %160 : vector<2x32xf32>
    %162 = arith.addf %158, %161 : vector<2x32xf32>
    %163 = math.tanh %162 : vector<2x32xf32>
    %cst_40 = arith.constant 1.000000e+00 : f32
    %164 = vector.broadcast %cst_40 : f32 to vector<2x32xf32>
    %165 = arith.subf %164, %157 : vector<2x32xf32>
    %166 = arith.mulf %165, %163 : vector<2x32xf32>
    %167 = arith.mulf %157, %136 : vector<2x32xf32>
    %168 = arith.addf %166, %167 : vector<2x32xf32>
    %c4 = arith.constant 4 : index
    %c0_41 = arith.constant 0 : index
    %c0_42 = arith.constant 0 : index
    %169 = vector.load %arg6[%c4, %c0_41, %c0_42] : memref<8x2x32xf32, #tpu.memory_space<vmem>>, vector<1x2x32xf32>
    %170 = vector.shape_cast %169 : vector<1x2x32xf32> to vector<2x32xf32>
    %171 = vector.shape_cast %168 : vector<2x32xf32> to vector<1x2x32xf32>
    tpu.vector_store %arg6[%c4, %c0_41, %c0_42], %171 {strides = array<i32>} : memref<8x2x32xf32, #tpu.memory_space<vmem>>, vector<1x2x32xf32>,
    %172 = vector.extract_strided_slice %5 {offsets = [10, 0], sizes = [2, 96], strides = [1, 1]} : vector<16x96xf32> to vector<2x96xf32>
    %cst_43 = arith.constant dense<0.000000e+00> : vector<2x96xf32>
    %173 = tpu.matmul %168, %6, %cst_43 {dimension_numbers = #tpu.dot_dimension_numbers<[1], [0], [0], [1], [0, 0, 1, 1], [], []>} : vector<2x32xf32>, vector<32x96xf32>, vector<2x96xf32> -> vector<2x96xf32>
    %174 = vector.extract_strided_slice %172 {offsets = [0, 0], sizes = [2, 32], strides = [1, 1]} : vector<2x96xf32> to vector<2x32xf32>
    %175 = vector.extract_strided_slice %173 {offsets = [0, 0], sizes = [2, 32], strides = [1, 1]} : vector<2x96xf32> to vector<2x32xf32>
    %176 = arith.addf %174, %175 : vector<2x32xf32>
    %177 = arith.negf %176 : vector<2x32xf32>
    %178 = math.exp %177 : vector<2x32xf32>
    %cst_44 = arith.constant 1.000000e+00 : f32
    %179 = vector.broadcast %cst_44 : f32 to vector<2x32xf32>
    %180 = arith.addf %179, %178 : vector<2x32xf32>
    %181 = arith.divf %179, %180 : vector<2x32xf32>
    %182 = vector.extract_strided_slice %172 {offsets = [0, 32], sizes = [2, 32], strides = [1, 1]} : vector<2x96xf32> to vector<2x32xf32>
    %183 = vector.extract_strided_slice %173 {offsets = [0, 32], sizes = [2, 32], strides = [1, 1]} : vector<2x96xf32> to vector<2x32xf32>
    %184 = arith.addf %182, %183 : vector<2x32xf32>
    %185 = arith.negf %184 : vector<2x32xf32>
    %186 = math.exp %185 : vector<2x32xf32>
    %cst_45 = arith.constant 1.000000e+00 : f32
    %187 = vector.broadcast %cst_45 : f32 to vector<2x32xf32>
    %188 = arith.addf %187, %186 : vector<2x32xf32>
    %189 = arith.divf %187, %188 : vector<2x32xf32>
    %190 = vector.extract_strided_slice %172 {offsets = [0, 64], sizes = [2, 32], strides = [1, 1]} : vector<2x96xf32> to vector<2x32xf32>
    %191 = vector.extract_strided_slice %173 {offsets = [0, 64], sizes = [2, 32], strides = [1, 1]} : vector<2x96xf32> to vector<2x32xf32>
    %192 = arith.addf %191, %9 : vector<2x32xf32>
    %193 = arith.mulf %181, %192 : vector<2x32xf32>
    %194 = arith.addf %190, %193 : vector<2x32xf32>
    %195 = math.tanh %194 : vector<2x32xf32>
    %cst_46 = arith.constant 1.000000e+00 : f32
    %196 = vector.broadcast %cst_46 : f32 to vector<2x32xf32>
    %197 = arith.subf %196, %189 : vector<2x32xf32>
    %198 = arith.mulf %197, %195 : vector<2x32xf32>
    %199 = arith.mulf %189, %168 : vector<2x32xf32>
    %200 = arith.addf %198, %199 : vector<2x32xf32>
    %c5 = arith.constant 5 : index
    %c0_47 = arith.constant 0 : index
    %c0_48 = arith.constant 0 : index
    %201 = vector.load %arg6[%c5, %c0_47, %c0_48] : memref<8x2x32xf32, #tpu.memory_space<vmem>>, vector<1x2x32xf32>
    %202 = vector.shape_cast %201 : vector<1x2x32xf32> to vector<2x32xf32>
    %203 = vector.shape_cast %200 : vector<2x32xf32> to vector<1x2x32xf32>
    tpu.vector_store %arg6[%c5, %c0_47, %c0_48], %203 {strides = array<i32>} : memref<8x2x32xf32, #tpu.memory_space<vmem>>, vector<1x2x32xf32>,
    %204 = vector.extract_strided_slice %5 {offsets = [12, 0], sizes = [2, 96], strides = [1, 1]} : vector<16x96xf32> to vector<2x96xf32>
    %cst_49 = arith.constant dense<0.000000e+00> : vector<2x96xf32>
    %205 = tpu.matmul %200, %6, %cst_49 {dimension_numbers = #tpu.dot_dimension_numbers<[1], [0], [0], [1], [0, 0, 1, 1], [], []>} : vector<2x32xf32>, vector<32x96xf32>, vector<2x96xf32> -> vector<2x96xf32>
    %206 = vector.extract_strided_slice %204 {offsets = [0, 0], sizes = [2, 32], strides = [1, 1]} : vector<2x96xf32> to vector<2x32xf32>
    %207 = vector.extract_strided_slice %205 {offsets = [0, 0], sizes = [2, 32], strides = [1, 1]} : vector<2x96xf32> to vector<2x32xf32>
    %208 = arith.addf %206, %207 : vector<2x32xf32>
    %209 = arith.negf %208 : vector<2x32xf32>
    %210 = math.exp %209 : vector<2x32xf32>
    %cst_50 = arith.constant 1.000000e+00 : f32
    %211 = vector.broadcast %cst_50 : f32 to vector<2x32xf32>
    %212 = arith.addf %211, %210 : vector<2x32xf32>
    %213 = arith.divf %211, %212 : vector<2x32xf32>
    %214 = vector.extract_strided_slice %204 {offsets = [0, 32], sizes = [2, 32], strides = [1, 1]} : vector<2x96xf32> to vector<2x32xf32>
    %215 = vector.extract_strided_slice %205 {offsets = [0, 32], sizes = [2, 32], strides = [1, 1]} : vector<2x96xf32> to vector<2x32xf32>
    %216 = arith.addf %214, %215 : vector<2x32xf32>
    %217 = arith.negf %216 : vector<2x32xf32>
    %218 = math.exp %217 : vector<2x32xf32>
    %cst_51 = arith.constant 1.000000e+00 : f32
    %219 = vector.broadcast %cst_51 : f32 to vector<2x32xf32>
    %220 = arith.addf %219, %218 : vector<2x32xf32>
    %221 = arith.divf %219, %220 : vector<2x32xf32>
    %222 = vector.extract_strided_slice %204 {offsets = [0, 64], sizes = [2, 32], strides = [1, 1]} : vector<2x96xf32> to vector<2x32xf32>
    %223 = vector.extract_strided_slice %205 {offsets = [0, 64], sizes = [2, 32], strides = [1, 1]} : vector<2x96xf32> to vector<2x32xf32>
    %224 = arith.addf %223, %9 : vector<2x32xf32>
    %225 = arith.mulf %213, %224 : vector<2x32xf32>
    %226 = arith.addf %222, %225 : vector<2x32xf32>
    %227 = math.tanh %226 : vector<2x32xf32>
    %cst_52 = arith.constant 1.000000e+00 : f32
    %228 = vector.broadcast %cst_52 : f32 to vector<2x32xf32>
    %229 = arith.subf %228, %221 : vector<2x32xf32>
    %230 = arith.mulf %229, %227 : vector<2x32xf32>
    %231 = arith.mulf %221, %200 : vector<2x32xf32>
    %232 = arith.addf %230, %231 : vector<2x32xf32>
    %c6 = arith.constant 6 : index
    %c0_53 = arith.constant 0 : index
    %c0_54 = arith.constant 0 : index
    %233 = vector.load %arg6[%c6, %c0_53, %c0_54] : memref<8x2x32xf32, #tpu.memory_space<vmem>>, vector<1x2x32xf32>
    %234 = vector.shape_cast %233 : vector<1x2x32xf32> to vector<2x32xf32>
    %235 = vector.shape_cast %232 : vector<2x32xf32> to vector<1x2x32xf32>
    tpu.vector_store %arg6[%c6, %c0_53, %c0_54], %235 {strides = array<i32>} : memref<8x2x32xf32, #tpu.memory_space<vmem>>, vector<1x2x32xf32>,
    %236 = vector.extract_strided_slice %5 {offsets = [14, 0], sizes = [2, 96], strides = [1, 1]} : vector<16x96xf32> to vector<2x96xf32>
    %cst_55 = arith.constant dense<0.000000e+00> : vector<2x96xf32>
    %237 = tpu.matmul %232, %6, %cst_55 {dimension_numbers = #tpu.dot_dimension_numbers<[1], [0], [0], [1], [0, 0, 1, 1], [], []>} : vector<2x32xf32>, vector<32x96xf32>, vector<2x96xf32> -> vector<2x96xf32>
    %238 = vector.extract_strided_slice %236 {offsets = [0, 0], sizes = [2, 32], strides = [1, 1]} : vector<2x96xf32> to vector<2x32xf32>
    %239 = vector.extract_strided_slice %237 {offsets = [0, 0], sizes = [2, 32], strides = [1, 1]} : vector<2x96xf32> to vector<2x32xf32>
    %240 = arith.addf %238, %239 : vector<2x32xf32>
    %241 = arith.negf %240 : vector<2x32xf32>
    %242 = math.exp %241 : vector<2x32xf32>
    %cst_56 = arith.constant 1.000000e+00 : f32
    %243 = vector.broadcast %cst_56 : f32 to vector<2x32xf32>
    %244 = arith.addf %243, %242 : vector<2x32xf32>
    %245 = arith.divf %243, %244 : vector<2x32xf32>
    %246 = vector.extract_strided_slice %236 {offsets = [0, 32], sizes = [2, 32], strides = [1, 1]} : vector<2x96xf32> to vector<2x32xf32>
    %247 = vector.extract_strided_slice %237 {offsets = [0, 32], sizes = [2, 32], strides = [1, 1]} : vector<2x96xf32> to vector<2x32xf32>
    %248 = arith.addf %246, %247 : vector<2x32xf32>
    %249 = arith.negf %248 : vector<2x32xf32>
    %250 = math.exp %249 : vector<2x32xf32>
    %cst_57 = arith.constant 1.000000e+00 : f32
    %251 = vector.broadcast %cst_57 : f32 to vector<2x32xf32>
    %252 = arith.addf %251, %250 : vector<2x32xf32>
    %253 = arith.divf %251, %252 : vector<2x32xf32>
    %254 = vector.extract_strided_slice %236 {offsets = [0, 64], sizes = [2, 32], strides = [1, 1]} : vector<2x96xf32> to vector<2x32xf32>
    %255 = vector.extract_strided_slice %237 {offsets = [0, 64], sizes = [2, 32], strides = [1, 1]} : vector<2x96xf32> to vector<2x32xf32>
    %256 = arith.addf %255, %9 : vector<2x32xf32>
    %257 = arith.mulf %245, %256 : vector<2x32xf32>
    %258 = arith.addf %254, %257 : vector<2x32xf32>
    %259 = math.tanh %258 : vector<2x32xf32>
    %cst_58 = arith.constant 1.000000e+00 : f32
    %260 = vector.broadcast %cst_58 : f32 to vector<2x32xf32>
    %261 = arith.subf %260, %253 : vector<2x32xf32>
    %262 = arith.mulf %261, %259 : vector<2x32xf32>
    %263 = arith.mulf %253, %232 : vector<2x32xf32>
    %264 = arith.addf %262, %263 : vector<2x32xf32>
    %c7 = arith.constant 7 : index
    %c0_59 = arith.constant 0 : index
    %c0_60 = arith.constant 0 : index
    %265 = vector.load %arg6[%c7, %c0_59, %c0_60] : memref<8x2x32xf32, #tpu.memory_space<vmem>>, vector<1x2x32xf32>
    %266 = vector.shape_cast %265 : vector<1x2x32xf32> to vector<2x32xf32>
    %267 = vector.shape_cast %264 : vector<2x32xf32> to vector<1x2x32xf32>
    tpu.vector_store %arg6[%c7, %c0_59, %c0_60], %267 {strides = array<i32>} : memref<8x2x32xf32, #tpu.memory_space<vmem>>, vector<1x2x32xf32>,
    %c0_61 = arith.constant 0 : index
    %c0_62 = arith.constant 0 : index
    %c0_63 = arith.constant 0 : index
    %268 = vector.load %arg7[%c0_61, %c0_62, %c0_63] : memref<1x2x32xf32, #tpu.memory_space<vmem>>, vector<1x2x32xf32>
    %269 = vector.shape_cast %268 : vector<1x2x32xf32> to vector<2x32xf32>
    %270 = vector.shape_cast %264 : vector<2x32xf32> to vector<1x2x32xf32>
    tpu.vector_store %arg7[%c0_61, %c0_62, %c0_63], %270 {strides = array<i32>} : memref<1x2x32xf32, #tpu.memory_space<vmem>>, vector<1x2x32xf32>,
    return
  }
}

</mosaic_0001>

<bundles_post_ra>
// kernel: tpu_custom_call.1
= control target key start
LH: loop header
LB: loop body
LE: loop exit
PB: predicated region body
PF: predicated region fallthrough
CT: control target
= control target key end

     0   :  { %13 = vsyncpa [#allocation3], 0  ;;  %s1752_s0 = inlined_call_operand.hbm [shape: f32[16,32], index: 0, kind: input, shape index: {}]   ;;  %s1753_s1 = inlined_call_operand.hbm [shape: f32[1,2,32], index: 1, kind: input, shape index: {}]   ;;  %s1754_s2 = inlined_call_operand.hbm [shape: f32[32,96], index: 2, kind: input, shape index: {}]   ;;  %s1755_s3 = inlined_call_operand.hbm [shape: f32[32,96], index: 3, kind: input, shape index: {}]   ;;  %s1756_s4 = inlined_call_operand.vmem [shape: f32[1,96], index: 4, kind: input, shape index: {}]   ;;  %s1757_s5 = inlined_call_operand.vmem [shape: f32[1,32], index: 5, kind: input, shape index: {}]   ;;  %s1758_s6 = inlined_call_operand.hbm [shape: f32[8,2,32], index: 6, kind: output, shape index: {0}]   ;;  %s1759_s7 = inlined_call_operand.hbm [shape: f32[1,2,32], index: 7, kind: output, shape index: {1}]  }
   0x1   :  { %14 = vsyncpa [#allocation6], 0 }
   0x2   :  { %15 = vsyncpa [#allocation9], 0 }
   0x3   :  { %16 = vsyncpa [#allocation4], 0 }
   0x4   :  { %17 = vsyncpa [#allocation12], 0  ;;  %s1479_s24 = smov [#allocation5]   ;;  %s1480_s26 = smov [#allocation2]  }
   0x5   :  { %s36_s25 = sshll.u32 %s1479_s24, 4  ;;  %s23_s27 = sshll.u32 %s1480_s26, 4  ;;  %s37_s25 = int_to_ptr.vmem [resolvable:$true] %s36_s25  ;;  %s24_s27 = int_to_ptr.vmem [resolvable:$true] %s23_s27 }
   0x6   :  { %s1357_s28 = scalar_lea.vmem %s37_s25, 32  ;;  %p1362_p1 = scmp.lt.s32.totalorder %s37_s25, %s37_s25 }
   0x7   :  { %p1358_p0 = scmp.ne.s32.totalorder %s37_s25, %s1357_s28  ;;  %p1363_p2 = scmp.lt.s32.totalorder %s1357_s28, %s1357_s28 }
   0x9   :  { %p1364_p3 = por %p1363_p2, %p1362_p1 }
   0xb   :  { %p1365_p4 = pnand %p1364_p3, %p1358_p0 }
   0xd   :  { %1368 = shalt.err (!%p1365_p4)
}
   0xe   :  { %39 = dma.hbm_to_vmem [thread:$0]  %s1753_s1, 32, %s37_s25, [#allocation6]  }
   0xf   :  { %s1377_s8 = scalar_lea.vmem %s24_s27, 256  ;;  %p1382_p6 = scmp.lt.s32.totalorder %s24_s27, %s24_s27 }
  0x10   :  { %p1378_p5 = scmp.ne.s32.totalorder %s24_s27, %s1377_s8  ;;  %p1383_p7 = scmp.lt.s32.totalorder %s1377_s8, %s1377_s8 }
  0x12   :  { %p1384_p8 = por %p1383_p7, %p1382_p6 }
  0x14   :  { %p1385_p9 = pnand %p1384_p8, %p1378_p5 }
  0x16   :  { %1388 = shalt.err (!%p1385_p9)
}
  0x17   :  { %s1481_s9 = smov 128   ;;  %s1482_s10 = smov 8  }
  0x18   :  { %29 = dma.hbm_to_vmem [thread:$0]  %s1752_s0, 256, %s24_s27, [#allocation3], %s1481_s9, %s1481_s9, %s1482_s10  }
  0x19   :  { %s1483_s13 = smov [#allocation7]   ;;  %s1484_s15 = smov [#allocation8]  }
  0x1a   :  { %s45_s14 = sshll.u32 %s1483_s13, 4  ;;  %s57_s16 = sshll.u32 %s1484_s15, 4  ;;  %s46_s14 = int_to_ptr.vmem [resolvable:$true] %s45_s14  ;;  %s58_s16 = int_to_ptr.vmem [resolvable:$true] %s57_s16 }
  0x1b   :  { %s1397_s1 = scalar_lea.vmem %s46_s14, 512  ;;  %p1402_p11 = scmp.lt.s32.totalorder %s46_s14, %s46_s14 }
  0x1c   :  { %p1398_p10 = scmp.ne.s32.totalorder %s46_s14, %s1397_s1  ;;  %p1403_p12 = scmp.lt.s32.totalorder %s1397_s1, %s1397_s1 }
  0x1e   :  { %p1404_p13 = por %p1403_p12, %p1402_p11 }
  0x20   :  { %p1405_p0 = pnand %p1404_p13, %p1398_p10 }
  0x22   :  { %1408 = shalt.err (!%p1405_p0)
}
  0x23   :  { %51 = dma.hbm_to_vmem [thread:$0]  %s1754_s2, 512, %s46_s14, [#allocation6], %s1481_s9, %s1481_s9, %s1482_s10  }
  0x24   :  { %s1417_s19 = scalar_lea.vmem %s58_s16, 512  ;;  %p1422_p2 = scmp.lt.s32.totalorder %s58_s16, %s58_s16 }
  0x25   :  { %p1418_p1 = scmp.ne.s32.totalorder %s58_s16, %s1417_s19  ;;  %p1423_p3 = scmp.lt.s32.totalorder %s1417_s19, %s1417_s19 }
  0x27   :  { %p1424_p4 = por %p1423_p3, %p1422_p2 }
  0x29   :  { %p1425_p5 = pnand %p1424_p4, %p1418_p1 }
  0x2b   :  { %1428 = shalt.err (!%p1425_p5)
}
  0x2c   :  { %63 = dma.hbm_to_vmem [thread:$0]  %s1755_s3, 512, %s58_s16, [#allocation9], %s1481_s9, %s1481_s9, %s1482_s10  }
  0x2d   :  { %1469 = dma.done.wait [#allocation3], 256  }
  0x2e   :  { %1470 = vsyncadd [#allocation3], 4294967040 }
  0x2f   :  { %1471 = dma.done.wait [#allocation6], 544  }
  0x30   :  { %1472 = vsyncadd [#allocation6], 4294966752 }
  0x31   :  { %1473 = dma.done.wait [#allocation9], 512  }
  0x32   :  { %1474 = vsyncadd [#allocation9], 4294966784  ;;  %v1485_v0 = vmov 0.0   ;;  %vm1486_vm0 = vmmov 0   ;;  %v85_v1 = vld [vmem:[#allocation7 + $0x18] sm:$0xff]  ;;  %v84_v3 = vld [vmem:[#allocation7 + $0x10] sm:$0xff] }
  0x33   :  { %1199 = vmatprep.subr.mxu1 %v1485_v0  ;;  %1207 = vmatprep.mubr.msk.f32.mxu1 %vm1486_vm0, %v1485_v0  ;;  %v1548_v2 = vld [vmem:[#allocation8 + $0x18] sm:$0xff]  ;;  %v1551_v4 = vld [vmem:[#allocation8 + $0x10] sm:$0xff]  ;;  %v83_v5 = vld [vmem:[#allocation7 + $0x8] sm:$0xff]  ;;  %vm93_vm1 = vcmask 261120   ;;  %s1487_s21 = smov 64   ;;  %s1488_s23 = smov 32  }
  0x34   :  { %1188 = vmatprep.subr.mxu0 %v85_v1  ;;  %1200 = vmatpush3.msra.mxu1 %v1548_v2  ;;  %v1554_v6 = vld [vmem:[#allocation8 + $0x8] sm:$0xff]  ;;  %v82_v7 = vld [vmem:[#allocation7] sm:$0xff]  ;;  %v185_v10 = vld [vmem:[#allocation5] sm:$0x3]  ;;  %vm296_vm2 = vcmask 254976   ;;  %vm408_vm3 = vcmask 257026  }
  0x35   :  { %1189 = vmatpush3.msra.mxu0 %v85_v1  ;;  %1201 = vmatprep.subr.mxu1 %v1485_v0  ;;  %v1558_v8 = vld [vmem:[#allocation8] sm:$0xff]  ;;  %v80_v9 = vld [vmem:[#allocation2] sm:$0xff]  ;;  %v81_v11 = vld [vmem:[#allocation2 + $0x8] sm:$0xff]  ;;  %vm638_vm4 = vcmask 261126   ;;  %vm523_vm5 = vcmask 259076   ;;  %s1490_s24 = smov [#allocation10]  }
  0x36   :  { %1190 = vmatprep.subr.mxu0 %v84_v3  ;;  %1202 = vmatpush3.msra.mxu1 %v1551_v4  ;;  %v1125_v12 = vld [vmem:[%s1757_s5] ss:$0 sm:$0xff]  ;;  %s1094_s25 = sshll.u32 %s1490_s24, 4  ;;  %s1491_s26 = smov [#allocation11]   ;;  %s1095_s25 = int_to_ptr.vmem [resolvable:$true] %s1094_s25 }
  0x37   :  { %1191 = vmatpush3.msra.mxu0 %v84_v3  ;;  %1203 = vmatprep.subr.mxu1 %v1485_v0  ;;  %v1122_v16 = vld [vmem:[%s1756_s4] ss:$0 sm:$0xff]  ;;  %s1489_s4 = smov 96   ;;  %s1107_s27 = sshll.u32 %s1491_s26, 4  ;;  %s1108_s27 = int_to_ptr.vmem [resolvable:$true] %s1107_s27 }
  0x38   :  { %1192 = vmatprep.subr.mxu0 %v83_v5  ;;  %1204 = vmatpush3.msra.mxu1 %v1554_v6  ;;  %s1429_s28 = scalar_lea.vmem %s1095_s25, 256  ;;  %p1434_p7 = scmp.lt.s32.totalorder %s1095_s25, %s1095_s25 }
  0x39   :  { %1193 = vmatpush3.msra.mxu0 %v83_v5  ;;  %1205 = vmatprep.subr.mxu1 %v1485_v0  ;;  %p1430_p6 = scmp.ne.s32.totalorder %s1095_s25, %s1429_s28  ;;  %p1435_p8 = scmp.lt.s32.totalorder %s1429_s28, %s1429_s28 }
  0x3a   :  { %1194 = vmatprep.subr.mxu0 %v82_v7  ;;  %1206 = vmatpush3.msra.mxu1 %v1558_v8 }
  0x3b   :  { %1195 = vmatpush3.msra.mxu0 %v82_v7  ;;  %1196 = vmatprep.mubr.msk.f32.mxu0 %vm93_vm1, %v80_v9  ;;  %p1436_p9 = por %p1435_p8, %p1434_p7 }
  0x3c   :  { %1208 = vmatmul.mubr.msk.f32.vlgmr.msra.gmra.mxu1 %vm93_vm1, %v185_v10  ;;  %1197 = vmatmul.mubr.msk.f32.vlgmr.msra.gmra.mxu0 %vm93_vm1, %v81_v11 }
  0x3d   :  { %266 = vrot.lane.b32.xlu0 %v1125_v12, %s1487_s21  ;;  %1210 = vmatprep.subr.mxu0 %v1485_v0  ;;  %p1437_p10 = pnand %p1436_p9, %p1430_p6 }
  0x3e   :  { %1211 = vmatpush3.msra.mxu0 %v1548_v2  ;;  %1218 = vmatprep.mubr.msk.f32.mxu0 %vm1486_vm0, %v1485_v0 }
  0x3f   :  { %1212 = vmatprep.subr.mxu0 %v1485_v0  ;;  %1221 = vmatprep.subr.mxu1 %v1485_v0 }
  0x40   :  { %1213 = vmatpush3.msra.mxu0 %v1551_v4  ;;  %1222 = vmatpush3.msra.mxu1 %v1548_v2 }
  0x41   :  { %1214 = vmatprep.subr.mxu0 %v1485_v0  ;;  %1223 = vmatprep.subr.mxu1 %v1485_v0 }
  0x42   :  { %1215 = vmatpush3.msra.mxu0 %v1554_v6  ;;  %1224 = vmatpush3.msra.mxu1 %v1551_v4 }
  0x43   :  { %1216 = vmatprep.subr.mxu0 %v1485_v0  ;;  %1225 = vmatprep.subr.mxu1 %v1485_v0 }
  0x44   :  { %1217 = vmatpush3.msra.mxu0 %v1558_v8  ;;  %1226 = vmatpush3.msra.mxu1 %v1554_v6 }
  0x45   :  { %1227 = vmatprep.subr.mxu1 %v1485_v0  ;;  %1229 = vmatprep.mubr.msk.f32.mxu1 %vm1486_vm0, %v1485_v0 }
  0x46   :  { %1228 = vmatpush3.msra.mxu1 %v1558_v8  ;;  %1232 = vmatprep.subr.mxu0 %v1485_v0 }
  0x47   :  { %1243 = vmatprep.subr.mxu1 %v1485_v0 }
  0xaf   :  { %v1592_v13 = vpop.permute.xlu0 %266 }
  0xfc   :  { %v255_v14 = vpop.f32.mrf.mxu1  ;;  %v1198_v15 = vpop.f32.mrf.mxu0 }
  0xfd   :  { %v269_v17 = vadd.f32 %v1592_v13, %v255_v14  ;;  %v1598_v18 = vadd.f32 %v1198_v15, %v1122_v16 }
  0xfe   :  { %v1209_v19 = vpop.f32.mrf.mxu1  ;;  %v166_v20 = vpop.f32.mrf.mxu0 }
  0xff   :  { %271 = vrot.lane.b32.xlu0 %v269_v17, %s1487_s21  ;;  %v1602_v21 = vadd.f32 %v1122_v16, %v166_v20 }
 0x101   :  { %v259_v22 = vadd.f32 %v255_v14, %v1602_v21 }
 0x103   :  { %287 = vrot.lane.b32.xlu0 %v185_v10, %s1488_s23  ;;  %v1127_v23 = vmul.f32 -1.442695, %v259_v22 }
 0x105   :  { %1301 = vpow2.f32 %v1127_v23 }
 0x112   :  { %v1302_v24 = vpop.eup %1301 }
 0x113   :  { %v263_v25 = vadd.f32 1.0, %v1302_v24 }
 0x115   :  { %1303 = vrcp.f32 %v263_v25 }
 0x122   :  { %v1304_v26 = vpop.eup %1303 }
 0x123   :  { %v281_v33 = vsub.f32 1.0, %v1304_v26 }
 0x171   :  { %v272_v27 = vpop.permute.xlu0 %271 }
 0x172   :  { %v274_v28 = vmul.f32 %v1304_v26, %v272_v27 }
 0x174   :  { %276 = vrot.lane.b32.xlu1 %v274_v28, %s1487_s21 }
 0x175   :  { %v288_v32 = vpop.permute.xlu0 %287 }
 0x176   :  { %v290_v35 = vmul.f32 %v1304_v26, %v288_v32 }
 0x1e6   :  { %v277_v29 = vpop.permute.xlu1 %276 }
 0x1e7   :  { %v279_v30 = vadd.f32 %v277_v29, %v1602_v21 }
 0x1e9   :  { %1305 = vtanh.f32 %v279_v30 }
 0x1f6   :  { %v1306_v31 = vpop.eup %1305 }
 0x1f7   :  { %283 = vrot.lane.b32.xlu1 %v1306_v31, %s1489_s4 }
 0x269   :  { %v284_v34 = vpop.permute.xlu1 %283 }
 0x26a   :  { %v286_v36 = vmul.f32 %v284_v34, %v281_v33 }
 0x26c   :  { %v291_v37 = vadd.f32 %v290_v35, %v286_v36 }
 0x26e   :  { %293 = vrot.lane.b32.xlu1 %v291_v37, %s1489_s4  ;;  %v399_v54 = vrot.slane %v291_v37, 6 }
 0x2e0   :  { %v294_v38 = vpop.permute.xlu1 %293 }
 0x2e1   :  { %297 = vst.msk [vmem:[#allocation10] sm:$0x3] %vm296_vm2, %v294_v38  ;;  %1219 = vmatmul.mubr.msk.f32.vlgmr.msra.gmra.mxu0 %vm93_vm1, %v294_v38 }
 0x2e2   :  { %1233 = vmatpush3.msra.mxu0 %v1548_v2  ;;  %1240 = vmatprep.mubr.msk.f32.mxu0 %vm1486_vm0, %v1485_v0 }
 0x2e3   :  { %1234 = vmatprep.subr.mxu0 %v1485_v0 }
 0x2e4   :  { %1235 = vmatpush3.msra.mxu0 %v1551_v4 }
 0x2e5   :  { %1236 = vmatprep.subr.mxu0 %v1485_v0 }
 0x2e6   :  { %1237 = vmatpush3.msra.mxu0 %v1554_v6 }
 0x2e7   :  { %1238 = vmatprep.subr.mxu0 %v1485_v0 }
 0x2e8   :  { %1239 = vmatpush3.msra.mxu0 %v1558_v8 }
 0x2e9   :  { %1254 = vmatprep.subr.mxu0 %v1485_v0 }
 0x3a1   :  { %v366_v39 = vpop.f32.mrf.mxu0 }
 0x3a2   :  { %v380_v40 = vadd.f32 %v366_v39, %v1592_v13  ;;  %v371_v43 = vrot.slane %v366_v39, 6 }
 0x3a3   :  { %v1220_v41 = vpop.f32.mrf.mxu0 }
 0x3a4   :  { %v382_v42 = vrot.slane %v380_v40, 6  ;;  %v373_v44 = vadd.f32 %v371_v43, %v1602_v21 }
 0x3a6   :  { %383 = vrot.lane.b32.xlu0 %v382_v42, %s1487_s21  ;;  %v1129_v45 = vmul.f32 -1.442695, %v373_v44 }
 0x3a8   :  { %1307 = vpow2.f32 %v1129_v45 }
 0x3b5   :  { %v1308_v46 = vpop.eup %1307 }
 0x3b6   :  { %v377_v47 = vadd.f32 1.0, %v1308_v46 }
 0x3b8   :  { %1309 = vrcp.f32 %v377_v47 }
 0x3c5   :  { %v1310_v48 = vpop.eup %1309 }
 0x3c6   :  { %v393_v55 = vsub.f32 1.0, %v1310_v48  ;;  %v401_v58 = vmul.f32 %v1310_v48, %v399_v54 }
 0x418   :  { %v384_v49 = vpop.permute.xlu0 %383 }
 0x419   :  { %v386_v50 = vmul.f32 %v1310_v48, %v384_v49 }
 0x41b   :  { %388 = vrot.lane.b32.xlu1 %v386_v50, %s1487_s21 }
 0x48d   :  { %v389_v51 = vpop.permute.xlu1 %388 }
 0x48e   :  { %v391_v52 = vadd.f32 %v389_v51, %v1602_v21 }
 0x490   :  { %1311 = vtanh.f32 %v391_v52 }
 0x49d   :  { %v1312_v53 = vpop.eup %1311 }
 0x49e   :  { %395 = vrot.lane.b32.xlu0 %v1312_v53, %s1489_s4 }
 0x510   :  { %v396_v56 = vpop.permute.xlu0 %395 }
 0x511   :  { %v398_v57 = vmul.f32 %v396_v56, %v393_v55 }
 0x513   :  { %v1627_v59 = vadd.f32 %v401_v58, %v398_v57 }
 0x515   :  { %v410_v60 = vrot.slane %v1627_v59, 2  ;;  %v514_v22 = vrot.slane %v1627_v59, 6 }
 0x517   :  { %411 = vrot.lane.b32.xlu1 %v410_v60, %s1489_s4 }
 0x589   :  { %v412_v61 = vpop.permute.xlu1 %411 }
 0x58a   :  { %1230 = vmatmul.mubr.msk.f32.vlgmr.msra.gmra.mxu1 %vm93_vm1, %v412_v61 }
 0x58b   :  { %1244 = vmatpush3.msra.mxu1 %v1548_v2  ;;  %1251 = vmatprep.mubr.msk.f32.mxu1 %vm1486_vm0, %v1485_v0 }
 0x58c   :  { %1245 = vmatprep.subr.mxu1 %v1485_v0 }
 0x58d   :  { %1246 = vmatpush3.msra.mxu1 %v1551_v4 }
 0x58e   :  { %1247 = vmatprep.subr.mxu1 %v1485_v0 }
 0x58f   :  { %1248 = vmatpush3.msra.mxu1 %v1554_v6 }
 0x590   :  { %1249 = vmatprep.subr.mxu1 %v1485_v0 }
 0x591   :  { %1250 = vmatpush3.msra.mxu1 %v1558_v8 }
 0x592   :  { %1265 = vmatprep.subr.mxu1 %v1485_v0 }
 0x64a   :  { %v481_v62 = vpop.f32.mrf.mxu1 }
 0x64b   :  { %v495_v63 = vadd.f32 %v481_v62, %v1592_v13  ;;  %v486_v5 = vrot.slane %v481_v62, 4 }
 0x64c   :  { %v1231_v1 = vpop.f32.mrf.mxu1 }
 0x64d   :  { %v497_v3 = vrot.slane %v495_v63, 4  ;;  %v488_v7 = vadd.f32 %v486_v5, %v1602_v21 }
 0x64f   :  { %498 = vrot.lane.b32.xlu0 %v497_v3, %s1487_s21  ;;  %v1131_v9 = vmul.f32 -1.442695, %v488_v7 }
 0x651   :  { %1313 = vpow2.f32 %v1131_v9 }
 0x65e   :  { %v1314_v10 = vpop.eup %1313 }
 0x65f   :  { %v492_v11 = vadd.f32 1.0, %v1314_v10 }
 0x661   :  { %1315 = vrcp.f32 %v492_v11 }
 0x66e   :  { %v1316_v12 = vpop.eup %1315 }
 0x66f   :  { %v508_v20 = vsub.f32 1.0, %v1316_v12  ;;  %v516_v24 = vmul.f32 %v1316_v12, %v514_v22 }
 0x6c1   :  { %v499_v14 = vpop.permute.xlu0 %498 }
 0x6c2   :  { %v501_v15 = vmul.f32 %v1316_v12, %v499_v14 }
 0x6c4   :  { %503 = vrot.lane.b32.xlu1 %v501_v15, %s1487_s21 }
 0x736   :  { %v504_v16 = vpop.permute.xlu1 %503 }
 0x737   :  { %v506_v17 = vadd.f32 %v504_v16, %v1602_v21 }
 0x739   :  { %1317 = vtanh.f32 %v506_v17 }
 0x746   :  { %v1318_v19 = vpop.eup %1317 }
 0x747   :  { %510 = vrot.lane.b32.xlu0 %v1318_v19, %s1489_s4 }
 0x7b9   :  { %v511_v23 = vpop.permute.xlu0 %510 }
 0x7ba   :  { %v513_v25 = vmul.f32 %v511_v23, %v508_v20 }
 0x7bc   :  { %v1649_v26 = vadd.f32 %v516_v24, %v513_v25 }
 0x7be   :  { %v525_v27 = vrot.slane %v1649_v26, 4  ;;  %v629_v45 = vrot.slane %v1649_v26, 6 }
 0x7c0   :  { %526 = vrot.lane.b32.xlu1 %v525_v27, %s1489_s4 }
 0x832   :  { %v527_v28 = vpop.permute.xlu1 %526 }
 0x833   :  { %1241 = vmatmul.mubr.msk.f32.vlgmr.msra.gmra.mxu0 %vm93_vm1, %v527_v28 }
 0x834   :  { %1255 = vmatpush3.msra.mxu0 %v1548_v2  ;;  %1262 = vmatprep.mubr.msk.f32.mxu0 %vm1486_vm0, %v1485_v0 }
 0x835   :  { %1256 = vmatprep.subr.mxu0 %v1485_v0 }
 0x836   :  { %1257 = vmatpush3.msra.mxu0 %v1551_v4 }
 0x837   :  { %1258 = vmatprep.subr.mxu0 %v1485_v0 }
 0x838   :  { %1259 = vmatpush3.msra.mxu0 %v1554_v6 }
 0x839   :  { %1260 = vmatprep.subr.mxu0 %v1485_v0 }
 0x83a   :  { %1261 = vmatpush3.msra.mxu0 %v1558_v8 }
 0x83b   :  { %1276 = vmatprep.subr.mxu0 %v1485_v0 }
 0x8f3   :  { %v596_v29 = vpop.f32.mrf.mxu0 }
 0x8f4   :  { %v610_v30 = vadd.f32 %v596_v29, %v1592_v13  ;;  %v601_v33 = vrot.slane %v596_v29, 2 }
 0x8f5   :  { %v1242_v31 = vpop.f32.mrf.mxu0 }
 0x8f6   :  { %v612_v32 = vrot.slane %v610_v30, 2  ;;  %v603_v34 = vadd.f32 %v601_v33, %v1602_v21 }
 0x8f8   :  { %613 = vrot.lane.b32.xlu0 %v612_v32, %s1487_s21  ;;  %v1133_v35 = vmul.f32 -1.442695, %v603_v34 }
 0x8fa   :  { %1319 = vpow2.f32 %v1133_v35 }
 0x907   :  { %v1320_v36 = vpop.eup %1319 }
 0x908   :  { %v607_v37 = vadd.f32 1.0, %v1320_v36 }
 0x90a   :  { %1321 = vrcp.f32 %v607_v37 }
 0x917   :  { %v1322_v38 = vpop.eup %1321 }
 0x918   :  { %v623_v44 = vsub.f32 1.0, %v1322_v38  ;;  %v631_v47 = vmul.f32 %v1322_v38, %v629_v45 }
 0x96a   :  { %v614_v39 = vpop.permute.xlu0 %613 }
 0x96b   :  { %v616_v40 = vmul.f32 %v1322_v38, %v614_v39 }
 0x96d   :  { %618 = vrot.lane.b32.xlu1 %v616_v40, %s1487_s21 }
 0x9df   :  { %v619_v41 = vpop.permute.xlu1 %618 }
 0x9e0   :  { %v621_v42 = vadd.f32 %v619_v41, %v1602_v21 }
 0x9e2   :  { %1323 = vtanh.f32 %v621_v42 }
 0x9ef   :  { %v1324_v43 = vpop.eup %1323 }
 0x9f0   :  { %625 = vrot.lane.b32.xlu0 %v1324_v43, %s1489_s4 }
 0xa62   :  { %v626_v46 = vpop.permute.xlu0 %625 }
 0xa63   :  { %v628_v48 = vmul.f32 %v626_v46, %v623_v44 }
 0xa65   :  { %v1671_v49 = vadd.f32 %v631_v47, %v628_v48 }
 0xa67   :  { %v640_v50 = vrot.slane %v1671_v49, 6 }
 0xa69   :  { %641 = vrot.lane.b32.xlu1 %v640_v50, %s1489_s4 }
 0xadb   :  { %v642_v51 = vpop.permute.xlu1 %641 }
 0xadc   :  { %1252 = vmatmul.mubr.msk.f32.vlgmr.msra.gmra.mxu1 %vm93_vm1, %v642_v51 }
 0xadd   :  { %1266 = vmatpush3.msra.mxu1 %v1548_v2  ;;  %1273 = vmatprep.mubr.msk.f32.mxu1 %vm1486_vm0, %v1485_v0 }
 0xade   :  { %1267 = vmatprep.subr.mxu1 %v1485_v0 }
 0xadf   :  { %1268 = vmatpush3.msra.mxu1 %v1551_v4 }
 0xae0   :  { %1269 = vmatprep.subr.mxu1 %v1485_v0 }
 0xae1   :  { %1270 = vmatpush3.msra.mxu1 %v1554_v6 }
 0xae2   :  { %1271 = vmatprep.subr.mxu1 %v1485_v0 }
 0xae3   :  { %1272 = vmatpush3.msra.mxu1 %v1558_v8 }
 0xb9c   :  { %v711_v21 = vpop.f32.mrf.mxu1 }
 0xb9d   :  { %v722_v52 = vadd.f32 %v711_v21, %v1592_v13  ;;  %v715_v54 = vadd.f32 %v711_v21, %v1598_v18 }
 0xb9e   :  { %v1253_v53 = vpop.f32.mrf.mxu1 }
 0xb9f   :  { %724 = vrot.lane.b32.xlu0 %v722_v52, %s1487_s21  ;;  %v1135_v55 = vmul.f32 -1.442695, %v715_v54 }
 0xba1   :  { %1325 = vpow2.f32 %v1135_v55 }
 0xbae   :  { %v1326_v56 = vpop.eup %1325 }
 0xbaf   :  { %v719_v57 = vadd.f32 1.0, %v1326_v56 }
 0xbb1   :  { %1327 = vrcp.f32 %v719_v57 }
 0xbbe   :  { %v1328_v58 = vpop.eup %1327 }
 0xbbf   :  { %v734_v3 = vsub.f32 1.0, %v1328_v58  ;;  %v741_v7 = vmul.f32 %v1328_v58, %v640_v50 }
 0xc11   :  { %v725_v60 = vpop.permute.xlu0 %724 }
 0xc12   :  { %v727_v61 = vmul.f32 %v1328_v58, %v725_v60 }
 0xc14   :  { %729 = vrot.lane.b32.xlu1 %v727_v61, %s1487_s21 }
 0xc86   :  { %v730_v62 = vpop.permute.xlu1 %729 }
 0xc87   :  { %v732_v63 = vadd.f32 %v730_v62, %v1598_v18 }
 0xc89   :  { %1329 = vtanh.f32 %v732_v63 }
 0xc96   :  { %v1330_v1 = vpop.eup %1329 }
 0xc97   :  { %736 = vrot.lane.b32.xlu0 %v1330_v1, %s1489_s4 }
 0xd09   :  { %v737_v5 = vpop.permute.xlu0 %736 }
 0xd0a   :  { %v739_v9 = vmul.f32 %v737_v5, %v734_v3 }
 0xd0c   :  { %v742_v10 = vadd.f32 %v741_v7, %v739_v9 }
 0xd0e   :  { %744 = vrot.lane.b32.xlu1 %v742_v10, %s1489_s4  ;;  %v850_v25 = vrot.slane %v742_v10, 6 }
 0xd80   :  { %v745_v11 = vpop.permute.xlu1 %744 }
 0xd81   :  { %748 = vst.msk [vmem:[#allocation10 + $0x8] sm:$0x3] %vm296_vm2, %v745_v11  ;;  %1263 = vmatmul.mubr.msk.f32.vlgmr.msra.gmra.mxu0 %vm93_vm1, %v745_v11 }
 0xd82   :  { %1277 = vmatpush3.msra.mxu0 %v1548_v2  ;;  %1284 = vmatprep.mubr.msk.f32.mxu0 %vm1486_vm0, %v1485_v0 }
 0xd83   :  { %1278 = vmatprep.subr.mxu0 %v1485_v0 }
 0xd84   :  { %1279 = vmatpush3.msra.mxu0 %v1551_v4 }
 0xd85   :  { %1280 = vmatprep.subr.mxu0 %v1485_v0 }
 0xd86   :  { %1281 = vmatpush3.msra.mxu0 %v1554_v6 }
 0xd87   :  { %1282 = vmatprep.subr.mxu0 %v1485_v0 }
 0xd88   :  { %1283 = vmatpush3.msra.mxu0 %v1558_v8 }
 0xe41   :  { %v817_v12 = vpop.f32.mrf.mxu0 }
 0xe42   :  { %v831_v14 = vadd.f32 %v817_v12, %v1592_v13  ;;  %v822_v16 = vrot.slane %v817_v12, 6 }
 0xe43   :  { %v1264_v15 = vpop.f32.mrf.mxu0 }
 0xe44   :  { %v833_v2 = vrot.slane %v831_v14, 6  ;;  %v824_v17 = vadd.f32 %v822_v16, %v1598_v18 }
 0xe46   :  { %834 = vrot.lane.b32.xlu0 %v833_v2, %s1487_s21  ;;  %v1137_v19 = vmul.f32 -1.442695, %v824_v17 }
 0xe48   :  { %1331 = vpow2.f32 %v1137_v19 }
 0xe55   :  { %v1332_v4 = vpop.eup %1331 }
 0xe56   :  { %v828_v20 = vadd.f32 1.0, %v1332_v4 }
 0xe58   :  { %1333 = vrcp.f32 %v828_v20 }
 0xe65   :  { %v1334_v6 = vpop.eup %1333 }
 0xe66   :  { %v844_v27 = vsub.f32 1.0, %v1334_v6  ;;  %v852_v30 = vmul.f32 %v1334_v6, %v850_v25 }
 0xeb8   :  { %v835_v22 = vpop.permute.xlu0 %834 }
 0xeb9   :  { %v837_v0 = vmul.f32 %v1334_v6, %v835_v22 }
 0xebb   :  { %839 = vrot.lane.b32.xlu1 %v837_v0, %s1487_s21 }
 0xf2d   :  { %v840_v8 = vpop.permute.xlu1 %839 }
 0xf2e   :  { %v842_v23 = vadd.f32 %v840_v8, %v1598_v18 }
 0xf30   :  { %1335 = vtanh.f32 %v842_v23 }
 0xf3d   :  { %v1336_v24 = vpop.eup %1335 }
 0xf3e   :  { %846 = vrot.lane.b32.xlu0 %v1336_v24, %s1489_s4 }
 0xfb0   :  { %v847_v28 = vpop.permute.xlu0 %846 }
 0xfb1   :  { %v849_v29 = vmul.f32 %v847_v28, %v844_v27 }
 0xfb3   :  { %v1709_v31 = vadd.f32 %v852_v30, %v849_v29 }
 0xfb5   :  { %v860_v32 = vrot.slane %v1709_v31, 2  ;;  %v964_v51 = vrot.slane %v1709_v31, 6 }
 0xfb7   :  { %861 = vrot.lane.b32.xlu1 %v860_v32, %s1489_s4 }
0x1029   :  { %v862_v33 = vpop.permute.xlu1 %861 }
0x102a   :  { %1274 = vmatmul.mubr.msk.f32.vlgmr.msra.gmra.mxu1 %vm93_vm1, %v862_v33 }
0x10ea   :  { %v931_v34 = vpop.f32.mrf.mxu1 }
0x10eb   :  { %v945_v35 = vadd.f32 %v931_v34, %v1592_v13  ;;  %v936_v38 = vrot.slane %v931_v34, 4 }
0x10ec   :  { %v1275_v36 = vpop.f32.mrf.mxu1 }
0x10ed   :  { %v947_v37 = vrot.slane %v945_v35, 4  ;;  %v938_v39 = vadd.f32 %v936_v38, %v1598_v18 }
0x10ef   :  { %948 = vrot.lane.b32.xlu0 %v947_v37, %s1487_s21  ;;  %v1139_v40 = vmul.f32 -1.442695, %v938_v39 }
0x10f1   :  { %1337 = vpow2.f32 %v1139_v40 }
0x10fe   :  { %v1338_v41 = vpop.eup %1337 }
0x10ff   :  { %v942_v42 = vadd.f32 1.0, %v1338_v41 }
0x1101   :  { %1339 = vrcp.f32 %v942_v42 }
0x110e   :  { %v1340_v43 = vpop.eup %1339 }
0x110f   :  { %v958_v50 = vsub.f32 1.0, %v1340_v43  ;;  %v966_v52 = vmul.f32 %v1340_v43, %v964_v51 }
0x1161   :  { %v949_v44 = vpop.permute.xlu0 %948 }
0x1162   :  { %v951_v45 = vmul.f32 %v1340_v43, %v949_v44 }
0x1164   :  { %953 = vrot.lane.b32.xlu1 %v951_v45, %s1487_s21 }
0x11d6   :  { %v954_v46 = vpop.permute.xlu1 %953 }
0x11d7   :  { %v956_v47 = vadd.f32 %v954_v46, %v1598_v18 }
0x11d9   :  { %1341 = vtanh.f32 %v956_v47 }
0x11e6   :  { %v1342_v48 = vpop.eup %1341 }
0x11e7   :  { %960 = vrot.lane.b32.xlu0 %v1342_v48, %s1489_s4 }
0x1259   :  { %v961_v21 = vpop.permute.xlu0 %960 }
0x125a   :  { %v963_v53 = vmul.f32 %v961_v21, %v958_v50 }
0x125c   :  { %v967_v54 = vadd.f32 %v966_v52, %v963_v53 }
0x125e   :  { %v974_v55 = vrot.slane %v967_v54, 4 }
0x1260   :  { %975 = vrot.lane.b32.xlu1 %v974_v55, %s1489_s4 }
0x12d2   :  { %v976_v56 = vpop.permute.xlu1 %975 }
0x12d3   :  { %1285 = vmatmul.mubr.msk.f32.vlgmr.msra.gmra.mxu0 %vm93_vm1, %v976_v56 }
0x1393   :  { %v1045_v57 = vpop.f32.mrf.mxu0 }
0x1394   :  { %v1059_v58 = vadd.f32 %v1045_v57, %v1592_v13  ;;  %v1050_v62 = vrot.slane %v1045_v57, 2 }
0x1395   :  { %v1286_v60 = vpop.f32.mrf.mxu0 }
0x1396   :  { %v1061_v61 = vrot.slane %v1059_v58, 2  ;;  %v1052_v63 = vadd.f32 %v1050_v62, %v1598_v18 }
0x1398   :  { %1062 = vrot.lane.b32.xlu0 %v1061_v61, %s1487_s21  ;;  %v1141_v1 = vmul.f32 -1.442695, %v1052_v63 }
0x139a   :  { %1343 = vpow2.f32 %v1141_v1 }
0x13a7   :  { %v1344_v3 = vpop.eup %1343 }
0x13a8   :  { %v1056_v5 = vadd.f32 1.0, %v1344_v3 }
0x13aa   :  { %1345 = vrcp.f32 %v1056_v5 }
0x13b7   :  { %v1346_v7 = vpop.eup %1345 }
0x140a   :  { %v1063_v9 = vpop.permute.xlu0 %1062 }
0x140b   :  { %v1065_v10 = vmul.f32 %v1346_v7, %v1063_v9 }
0x140d   :  { %1067 = vrot.lane.b32.xlu1 %v1065_v10, %s1487_s21 }
0x1411   :  { %404 = vrot.lane.b32.xlu1 %v1627_v59, %s1489_s4 }
0x1415   :  { %634 = vrot.lane.b32.xlu1 %v1671_v49, %s1489_s4  ;;  %v1078_v49 = vrot.slane %v967_v54, 6 }
0x1417   :  { %v1080_v16 = vmul.f32 %v1346_v7, %v1078_v49 }
0x1419   :  { %969 = vrot.lane.b32.xlu1 %v967_v54, %s1489_s4 }
0x147f   :  { %v1068_v13 = vpop.permute.xlu1 %1067 }
0x1480   :  { %v1070_v11 = vadd.f32 %v1068_v13, %v1598_v18  ;;  %v1072_v18 = vsub.f32 1.0, %v1346_v7 }
0x1482   :  { %1347 = vtanh.f32 %v1070_v11 }
0x1483   :  { %v405_v12 = vpop.permute.xlu1 %404 }
0x1484   :  { %409 = vst.msk [vmem:[#allocation10] sm:$0xc] %vm408_vm3, %v405_v12 }
0x1487   :  { %v635_v14 = vpop.permute.xlu1 %634 }
0x1488   :  { %639 = vst.msk [vmem:[#allocation10] sm:$0xc0] %vm638_vm4, %v635_v14 }
0x148b   :  { %v970_v15 = vpop.permute.xlu1 %969 }
0x148c   :  { %973 = vst.msk [vmem:[#allocation10 + $0x8] sm:$0x30] %vm523_vm5, %v970_v15 }
0x148f   :  { %v1348_v59 = vpop.eup %1347 }
0x1490   :  { %1074 = vrot.lane.b32.xlu0 %v1348_v59, %s1489_s4 }
0x1494   :  { %519 = vrot.lane.b32.xlu0 %v1649_v26, %s1489_s4 }
0x1498   :  { %855 = vrot.lane.b32.xlu0 %v1709_v31, %s1489_s4 }
0x1502   :  { %v1075_v2 = vpop.permute.xlu0 %1074 }
0x1503   :  { %v1077_v17 = vmul.f32 %v1075_v2, %v1072_v18 }
0x1505   :  { %v1081_v19 = vadd.f32 %v1080_v16, %v1077_v17 }
0x1506   :  { %v520_v4 = vpop.permute.xlu0 %519 }
0x1507   :  { %524 = vst.msk [vmem:[#allocation10] sm:$0x30] %vm523_vm5, %v520_v4  ;;  %1083 = vrot.lane.b32.xlu0 %v1081_v19, %s1489_s4 }
0x150a   :  { %v856_v20 = vpop.permute.xlu0 %855 }
0x150b   :  { %859 = vst.msk [vmem:[#allocation10 + $0x8] sm:$0xc] %vm408_vm3, %v856_v20 }
0x1579   :  { %v1084_v26 = vpop.permute.xlu0 %1083 }
0x157a   :  { %1087 = vst.msk [vmem:[#allocation10 + $0x8] sm:$0xc0] %vm638_vm4, %v1084_v26  ;;  %1088 = vst.msk [vmem:[#allocation11 - $0x6] sm:$0xc0] %vm638_vm4, %v1084_v26 }
0x157b   :  { %1440 = shalt.err (!%p1437_p10)
}
0x157c   :  { %s1492_s29 = smov 2   ;;  %s1449_s9 = scalar_lea.vmem %s1108_s27, 32 }
0x157d   :  { %1100 = dma.vmem_to_hbm [thread:$0]  %s1095_s25, 256, %s1758_s6, [#allocation4], %s1488_s23, %s1488_s23, %s1492_s29  }
0x157e   :  { %p1450_p11 = scmp.ne.s32.totalorder %s1108_s27, %s1449_s9  ;;  %p1454_p12 = scmp.lt.s32.totalorder %s1108_s27, %s1108_s27 }
0x157f   :  { %p1455_p13 = scmp.lt.s32.totalorder %s1449_s9, %s1449_s9 }
0x1581   :  { %p1456_p0 = por %p1455_p13, %p1454_p12 }
0x1583   :  { %p1457_p1 = pnand %p1456_p0, %p1450_p11 }
0x1585   :  { %1460 = shalt.err (!%p1457_p1)
}
0x1586   :  { %1110 = dma.vmem_to_hbm [thread:$0]  %s1108_s27, 32, %s1759_s7, [#allocation12]  }
0x1587   :  { %1475 = dma.done.wait [#allocation4], 256  }
0x1588   :  { %1476 = vsyncadd [#allocation4], 4294967040 }
0x1589   :  { %1477 = dma.done.wait [#allocation12], 32  }
0x158a   :  { %1478 = vsyncadd [#allocation12], 4294967264 }
0x158b   :  { %1117 = vsyncpa [#allocation3], 1 }
0x158c   :  { %1118 = vsyncpa [#allocation6], 1 }
0x158d   :  { %1119 = vsyncpa [#allocation9], 1 }
0x158e   :  { %1120 = vsyncpa [#allocation4], 1 }
0x158f   :  { %1121 = vsyncpa [#allocation12], 1 }

</bundles_post_ra>
